<compile_context>
chip_gen: v6e
topology: v6e:2x2x1
jax: 0.10.0
libtpu: 0.0.40
codegen_flags: <defaults>
</compile_context>

<pallas_src>
import jax
import jax.numpy as jnp
from jax import lax
from jax.experimental import pallas as pl
from jax.experimental.pallas import tpu as pltpu


def _round_up(x, m):
    return ((x + m - 1) // m) * m


def _patch_embed_kernel(x_ref, w_ref, b_ref, o_ref):
    # x_ref: (tile_m, K)     patch rows (compute dtype, K = C*ph*pw, unpadded)
    # w_ref: (K, N_pad)      weight, pre-transposed in the wrapper (resident)
    # b_ref: (1, N_pad)      bias (f32)
    # o_ref: (tile_m, N_pad) lane-dense output tile
    acc = jnp.dot(x_ref[...], w_ref[...], preferred_element_type=jnp.float32)
    o_ref[...] = (acc + b_ref[...]).astype(o_ref.dtype)


def swin_patch_embeddings(pixel_values, weight, bias, patch_size, *,
                          tile_m=512, compute_dtype=jnp.bfloat16,
                          out_dtype=None):
    """Swin patch embedding forward.

    pixel_values: (B, C, H, W)
    weight:       (hidden, C, ph, pw)   -- PyTorch Conv2d layout
    bias:         (hidden,)
    Returns (embeddings (B, num_patches, hidden), (H//ph, W//pw)).
    """
    ph, pw = (patch_size if isinstance(patch_size, (tuple, list))
              else (patch_size, patch_size))
    B, C, H, W = pixel_values.shape
    hidden, Cw, kh, kw = weight.shape
    assert (Cw, kh, kw) == (C, ph, pw), "weight shape inconsistent with config"

    out_dtype = out_dtype or pixel_values.dtype
    compute_dtype = compute_dtype or pixel_values.dtype

    # Cast BEFORE the unfold transpose so the layout pass moves half the bytes.
    if pixel_values.dtype != compute_dtype:
        pixel_values = pixel_values.astype(compute_dtype)

    # maybe_pad: right / bottom zero pad so H, W divide the patch size.
    pad_h = (-H) % ph
    pad_w = (-W) % pw
    if pad_h or pad_w:
        pixel_values = jnp.pad(
            pixel_values, ((0, 0), (0, 0), (0, pad_h), (0, pad_w)))
    Hp, Wp = (H + pad_h) // ph, (W + pad_w) // pw

    # Unfold patches: conv(kernel==stride) -> per-patch matmul. Pure layout glue.
    x = pixel_values.reshape(B, C, Hp, ph, Wp, pw)
    x = x.transpose(0, 2, 4, 1, 3, 5).reshape(B * Hp * Wp, C * ph * pw)

    # One-time weight prep (tiny): (hidden, K) -> (K, hidden) -> pad N to x128.
    K = C * ph * pw
    N_pad = _round_up(hidden, 128)
    w2d = weight.reshape(hidden, K).astype(compute_dtype).T          # (K, hidden)
    if N_pad != hidden:
        w2d = jnp.pad(w2d, ((0, 0), (0, N_pad - hidden)))
    b2d = bias.astype(jnp.float32)
    if N_pad != hidden:
        b2d = jnp.pad(b2d, (0, N_pad - hidden))
    b2d = b2d.reshape(1, N_pad)

    M = x.shape[0]

    # Tile M: as large as allowed, clamped to the problem, but keep >= 2 grid
    # steps when M permits so both v7x TensorCores get work.
    tile_m = _round_up(max(8, min(tile_m, _round_up(M, 8))), 8)
    if M > 8:
        tile_m = min(tile_m, _round_up(pl.cdiv(M, 2), 8))
    M_pad = _round_up(M, tile_m)
    if M_pad != M:
        x = jnp.pad(x, ((0, M_pad - M), (0, 0)))        # K stays unpadded

    grid = (M_pad // tile_m,)

    x_item = jnp.dtype(x.dtype).itemsize
    w_item = jnp.dtype(w2d.dtype).itemsize
    o_item = jnp.dtype(out_dtype).itemsize
    cost = pl.CostEstimate(
        flops=2 * M_pad * K * N_pad,
        transcendentals=0,
        bytes_accessed=(M_pad * K * x_item + K * N_pad * w_item
                        + N_pad * 4 + M_pad * N_pad * o_item),
    )

    # Scoped-VMEM heuristic: only raise above the 32 MiB default if needed, and
    # never above ~75% of the physical VMEM of this generation (v7x: 64 MiB).
    vmem_needed = (2 * tile_m * (K * x_item + N_pad * o_item)
                   + 2 * K * N_pad * w_item + 2 * N_pad * 4)
    vmem_limit = None
    if vmem_needed > 32 * 1024 * 1024:
        try:
            phys = pltpu.get_tpu_info().vmem_capacity_bytes
        except Exception:
            phys = 64 * 1024 * 1024
        vmem_limit = min(int(vmem_needed * 3 // 2), int(phys * 3 // 4))

    out2d = pl.pallas_call(
        _patch_embed_kernel,
        out_shape=jax.ShapeDtypeStruct((M_pad, N_pad), out_dtype),
        grid_spec=pltpu.PrefetchScalarGridSpec(
            num_scalar_prefetch=0,
            grid=grid,
            in_specs=[
                pl.BlockSpec((tile_m, K), lambda i: (i, 0)),    # patch rows, full-K block
                pl.BlockSpec((K, N_pad), lambda i: (0, 0)),     # weight, constant index -> resident
                pl.BlockSpec((1, N_pad), lambda i: (0, 0)),     # bias
            ],
            out_specs=pl.BlockSpec((tile_m, N_pad), lambda i: (i, 0)),
        ),
        compiler_params=pltpu.CompilerParams(
            dimension_semantics=("parallel",),
            vmem_limit_bytes=vmem_limit,
        ),
        cost_estimate=cost,
    )(x, w2d, b2d)

    # Strip padding only when padding was actually added (avoids a full
    # read+write of the largest tensor when hidden % 128 == 0 and M % tile == 0).
    if M_pad != M or N_pad != hidden:
        out2d = out2d[:M, :hidden]
    embeddings = out2d.reshape(B, Hp * Wp, hidden)
    return embeddings, (Hp, Wp)


def _reference(pixel_values, weight, bias, patch_size):
    """Pure-JAX reference replicating the PyTorch module (pad -> conv -> flatten)."""
    ph, pw = patch_size
    _, _, H, W = pixel_values.shape
    pad_h, pad_w = (-H) % ph, (-W) % pw
    x = jnp.pad(pixel_values, ((0, 0), (0, 0), (0, pad_h), (0, pad_w)))
    y = lax.conv_general_dilated(
        x, weight, window_strides=(ph, pw), padding="VALID",
        dimension_numbers=("NCHW", "OIHW", "NCHW"),
        precision=lax.Precision.HIGHEST,
    ) + bias.reshape(1, -1, 1, 1)
    B, N, Hp, Wp = y.shape
    emb = y.reshape(B, N, Hp * Wp).transpose(0, 2, 1)
    return emb, (Hp, Wp)


if __name__ == "__main__":
    # Small SwinConfig-like setup: image 16x16, patch 4, 4 channels, embed_dim 32.
    image_size, patch_size = 16, 4
    num_channels, embed_dim = 4, 32
    B = 2

    key = jax.random.PRNGKey(0)
    kx, kw, kb, kx2 = jax.random.split(key, 4)

    fan_in = num_channels * patch_size * patch_size
    bound = 1.0 / (fan_in ** 0.5)
    weight = jax.random.uniform(
        kw, (embed_dim, num_channels, patch_size, patch_size),
        jnp.float32, -bound, bound)
    bias = jax.random.uniform(kb, (embed_dim,), jnp.float32, -bound, bound)
    pixel_values = jax.random.normal(
        kx, (B, num_channels, image_size, image_size), jnp.float32)

    ref, ref_dims = _reference(pixel_values, weight, bias, (patch_size, patch_size))
    num_patches = (image_size // patch_size) ** 2

    # Default path: bf16 MXU operands, f32 accumulation, f32 output.
    emb, dims = swin_patch_embeddings(pixel_values, weight, bias,
                                      (patch_size, patch_size))
    emb = jax.block_until_ready(emb)
    assert emb.shape == (B, num_patches, embed_dim)
    assert dims == ref_dims == (image_size // patch_size, image_size // patch_size)
    assert jnp.allclose(emb, ref, atol=2e-2, rtol=2e-2), "bf16 mismatch vs conv reference"

    # Full-f32 path: tight tolerance vs the conv reference.
    emb_f32, _ = swin_patch_embeddings(pixel_values, weight, bias,
                                       (patch_size, patch_size),
                                       compute_dtype=jnp.float32)
    emb_f32 = jax.block_until_ready(emb_f32)
    assert jnp.allclose(emb_f32, ref, atol=1e-4, rtol=1e-4), "f32 mismatch vs conv reference"

    # Non-divisible spatial size exercises the maybe_pad path.
    pv_odd = jax.random.normal(kx2, (B, num_channels, 15, 17), jnp.float32)
    emb2, dims2 = swin_patch_embeddings(pv_odd, weight, bias,
                                        (patch_size, patch_size),
                                        compute_dtype=jnp.float32)
    emb2 = jax.block_until_ready(emb2)
    ref2, ref_dims2 = _reference(pv_odd, weight, bias, (patch_size, patch_size))
    assert dims2 == ref_dims2 == (4, 5)
    assert jnp.allclose(emb2, ref2, atol=1e-4, rtol=1e-4), "padded-input mismatch"

    print("KERNEL_OK")
</pallas_src>

<mosaic_0001>
module attributes {stable_mosaic.version = 11 : i64} {
  func.func @_patch_embed_kernel(%arg0: i32, %arg1: memref<16x64xbf16, #tpu.memory_space<vmem>>, %arg2: memref<64x128xbf16, #tpu.memory_space<vmem>>, %arg3: memref<1x128xf32, #tpu.memory_space<vmem>>, %arg4: memref<16x128xf32, #tpu.memory_space<vmem>>) attributes {dimension_semantics = [#tpu.dimension_semantics<parallel>], iteration_bounds = array<i64: 2>, scalar_prefetch = 0 : i64, scratch_operands = 0 : i64, tpu.core_type = #tpu.core_type<tc>, window_params = [{transform_indices = @transform_0, window_bounds = array<i64: 16, 64>}, {pipeline_mode = #tpu.pipeline_mode<synchronous>, transform_indices = @transform_1, window_bounds = array<i64: 64, 128>}, {pipeline_mode = #tpu.pipeline_mode<synchronous>, transform_indices = @transform_2, window_bounds = array<i64: 1, 128>}, {transform_indices = @transform_3, window_bounds = array<i64: 16, 128>}]} {
    %c0 = arith.constant 0 : index
    %c0_0 = arith.constant 0 : index
    %0 = vector.load %arg1[%c0, %c0_0] : memref<16x64xbf16, #tpu.memory_space<vmem>>, vector<16x64xbf16>
    %c0_1 = arith.constant 0 : index
    %c0_2 = arith.constant 0 : index
    %1 = vector.load %arg2[%c0_1, %c0_2] : memref<64x128xbf16, #tpu.memory_space<vmem>>, vector<64x128xbf16>
    %cst = arith.constant dense<0.000000e+00> : vector<16x128xf32>
    %2 = tpu.matmul %0, %1, %cst {dimension_numbers = #tpu.dot_dimension_numbers<[1], [0], [0], [1], [0, 0, 1, 1], [], []>} : vector<16x64xbf16>, vector<64x128xbf16>, vector<16x128xf32> -> vector<16x128xf32>
    %c0_3 = arith.constant 0 : index
    %c0_4 = arith.constant 0 : index
    %3 = vector.load %arg3[%c0_3, %c0_4] : memref<1x128xf32, #tpu.memory_space<vmem>>, vector<1x128xf32>
    %4 = vector.broadcast %3 : vector<1x128xf32> to vector<16x128xf32>
    %5 = arith.addf %2, %4 : vector<16x128xf32>
    %c0_5 = arith.constant 0 : index
    %c0_6 = arith.constant 0 : index
    %6 = vector.load %arg4[%c0_5, %c0_6] : memref<16x128xf32, #tpu.memory_space<vmem>>, vector<16x128xf32>
    tpu.vector_store %arg4[%c0_5, %c0_6], %5 {strides = array<i32>} : memref<16x128xf32, #tpu.memory_space<vmem>>, vector<16x128xf32>,
    return
  }
  func.func @transform_0(%arg0: i32) -> (i32, i32) {
    %c0_i32 = arith.constant 0 : i32
    %c0_i32_0 = arith.constant 0 : i32
    return %arg0, %c0_i32 : i32, i32
  }
  func.func @transform_1(%arg0: i32) -> (i32, i32) {
    %c0_i32 = arith.constant 0 : i32
    %c0_i32_0 = arith.constant 0 : i32
    %c0_i32_1 = arith.constant 0 : i32
    return %c0_i32, %c0_i32_0 : i32, i32
  }
  func.func @transform_2(%arg0: i32) -> (i32, i32) {
    %c0_i32 = arith.constant 0 : i32
    %c0_i32_0 = arith.constant 0 : i32
    %c0_i32_1 = arith.constant 0 : i32
    return %c0_i32, %c0_i32_0 : i32, i32
  }
  func.func @transform_3(%arg0: i32) -> (i32, i32) {
    %c0_i32 = arith.constant 0 : i32
    %c0_i32_0 = arith.constant 0 : i32
    return %arg0, %c0_i32 : i32, i32
  }
}

</mosaic_0001>

<bundles_post_ra>
// kernel: tpu_custom_call.1
= control target key start
LH: loop header
LB: loop body
LE: loop exit
PB: predicated region body
PF: predicated region fallthrough
CT: control target
= control target key end

     0   :  { %8 = vsyncpa [#allocation3], 0  ;;  %s847_s0 = inlined_call_operand.hbm [shape: bf16[32,64], index: 0, kind: input, shape index: {}]   ;;  %s848_s1 = inlined_call_operand.hbm [shape: bf16[64,128], index: 1, kind: input, shape index: {}]   ;;  %s849_s2 = inlined_call_operand.vmem [shape: f32[1,128], index: 2, kind: input, shape index: {}]   ;;  %s850_s3 = inlined_call_operand.hbm [shape: f32[32,128], index: 3, kind: output, shape index: {}]  }
   0x1   :  { %10 = vsyncpa [#allocation3 + $0x1], 0 }
   0x2   :  { %11 = vsyncpa [#allocation6], 0 }
   0x3   :  { %12 = vsyncpa [#allocation4], 0 }
   0x4   :  { %14 = vsyncpa [#allocation4 + $0x1], 0  ;;  %s660_s12 = smov 0   ;;  %s662_s13 = smov 0  }
   0x5   :  { %s664_s14 = smov 0   ;;  %s666_s15 = smov 0  }
   0x6 LB: > { %s681_s16 = sadd.s32 4294967295, %s629_s15   ;;  %s397_s17 = sadd.s32 4294967294, %s629_s15   ;;  %s629_s15 = sphi %s666_s15, %s872_s15   ;;  %s625_s14 = sphi %s664_s14, %s871_s14   ;;  %s621_s13 = sphi %s662_s13, %s870_s13   ;;  %s617_s12 = sphi %s660_s12, %s869_s12  }
   0x7   : > { %p40_p0 = scmp.ne.s32.totalorder %s621_s13, %s617_s12  ;;  %p851_p1 = scmp.eq.s32.totalorder %s681_s16, 0 }
   0x8   : > { %p112_p3 = scmp.eq.s32.totalorder %s397_s17, 1  ;;  %p398_p5 = scmp.ge.s32.totalorder %s629_s15, 1 }
   0x9   : > { %p690_p4 = por %p851_p1, %p40_p0  ;;  %p119_p7 = scmp.lt.s32.totalorder %s629_s15, 3 }
   0xa   : > { %p695_p6 = por %p112_p3, %p40_p0  ;;  %s631_s21 = smov [#allocation5]  }
   0xb   : > { %s855_s18 = scalar_select %p690_p4, 1, 0 }
   0xc   : > { %s856_s19 = scalar_select %p695_p6, 1, 0 }
   0xd   : > { %p700_p8 = pnand %p398_p5, %p119_p7  ;;  %s131_s22 = sshll.u32 %s631_s21, 4  ;;  %s132_s22 = int_to_ptr.vmem [resolvable:$true] %s131_s22 }
   0xe   : > { %s714_s24 = sadd.s32 1, %s629_s15   ;;  %s27_s25 = sadd.s32 1, %s625_s14 }
   0xf   : > { %s857_s20 = scalar_select %p700_p8, 1, 0 }
  0x10   : > { %p447_p9 = pneg %p700_p8  ;;  %s24_s26 = ssub.s32 %s629_s15, %s714_s24 }
  0x11   : > { %s518_s27 = scalar_lea.vmem %s132_s22, 512  ;;  %p526_p5 = scmp.lt.s32.totalorder %s132_s22, %s132_s22 }
  0x12   : > { %p709_p11 = pnand %p447_p9, %p851_p1  ;;  %p519_p13 = scmp.ne.s32.totalorder %s132_s22, %s518_s27 }
  0x13   : > { %p527_p7 = scmp.lt.s32.totalorder %s518_s27, %s518_s27 }
  0x14   : > { %p509_p12 = pneg %p709_p11 }
  0x15   : > { %p528_p10 = por %p527_p7, %p526_p5 }
  0x16   : > { %p521_p0 = pnand %p519_p13, %p509_p12 }
  0x18   : > { %p522_p3 = pneg %p521_p0 }
  0x1a   : > { %p529_p2 = pnand %p528_p10, %p522_p3 }
  0x1c   : > { %532 = shalt.err (!%p529_p2)
}
  0x1d   : > { %s632_s28 = smov 64   ;;  %s633_s29 = smov 4  }
  0x1e   : > { %450 = dma.hbm_to_vmem [thread:$0]  (!%p709_p11), %s848_s1, 512, %s132_s22, [#allocation6], %s632_s28, %s632_s28, %s633_s29  }
  0x1f   : > { %p25_p2 = scmp.eq.s32.totalorder %s24_s26, 0  ;;  %p34_p9 = scmp.ne.s32.totalorder %s625_s14, %s621_s13 }
  0x20   : > { %p35_p10 = scmp.eq.s32.totalorder %s629_s15, 0  ;;  %p460_p12 = scmp.lt.s32.totalorder %s629_s15, 2 }
  0x21   : > { %s734_s5 = scalar_select %p25_p2, %s625_s14, %s27_s25  }
  0x22   : > { %p36_p13 = por %p35_p10, %p34_p9  ;;  %p859_p0 = scmp.eq.s32.totalorder %s681_s16, 1 }
  0x23   : > { %s148_s7 = sand.u32 1, %s625_s14   ;;  %s420_s8 = sshll.u32 %s629_s15, 7 }
  0x24   : > { %p738_p3 = por %p859_p0, %p34_p9  ;;  %s401_s9 = sshll.u32 %s148_s7, 3 }
  0x25   : > { %s747_s17 = scalar_lea.hbm %s847_s0, %s420_s8  ;;  %s152_s21 = scalar_lea.vmem [#allocation2], %s401_s9 }
  0x26   : > { %s860_s6 = scalar_select %p738_p3, 1, 0 }
  0x27   : > { %s159_s22 = sshll.u32 %s152_s21, 4  ;;  %p749_p11 = pnand %p460_p12, %p36_p13  ;;  %s753_s22 = int_to_ptr.vmem [resolvable:$true] %s159_s22 }
  0x28   : > { %s755_s25 = scalar_lea.sflag [#allocation3], %s148_s7  ;;  %s533_s26 = scalar_lea.hbm %s747_s17, 128 }
  0x29   : > { %p534_p5 = scmp.ne.s32.totalorder %s747_s17, %s533_s26  ;;  %p535_p7 = pneg %p749_p11 }
  0x2a   : > { %s538_s4 = scalar_lea.hbm %s847_s0, 256  ;;  %p539_p10 = scmp.lt.s32.totalorder %s747_s17, %s847_s0 }
  0x2b   : > { %p536_p2 = pnand %p535_p7, %p534_p5  ;;  %p540_p12 = scmp.lt.s32.totalorder %s538_s4, %s533_s26 }
  0x2d   : > { %p537_p9 = pneg %p536_p2  ;;  %p541_p13 = por %p540_p12, %p539_p10 }
  0x2f   : > { %p542_p0 = pnand %p541_p13, %p537_p9 }
  0x31   : > { %545 = shalt.err (!%p542_p0)
}
  0x32   : > { %s546_s7 = scalar_lea.vmem %s753_s22, 128  ;;  %s634_s10 = smov [#allocation2]  }
  0x33   : > { %p547_p1 = scmp.ne.s32.totalorder %s753_s22, %s546_s7  ;;  %s551_s11 = sshll.u32 %s634_s10, 4  ;;  %s552_s11 = int_to_ptr.vmem [resolvable:$false] %s551_s11 }
  0x34   : > { %s553_s21 = scalar_lea.vmem %s552_s11, 256  ;;  %p554_p2 = scmp.lt.s32.totalorder %s753_s22, %s552_s11 }
  0x35   : > { %p549_p6 = pnand %p547_p1, %p535_p7  ;;  %p555_p3 = scmp.lt.s32.totalorder %s553_s21, %s546_s7 }
  0x37   : > { %p550_p5 = pneg %p549_p6  ;;  %p556_p4 = por %p555_p3, %p554_p2 }
  0x39   : > { %p557_p8 = pnand %p556_p4, %p550_p5 }
  0x3b   : > { %560 = shalt.err (!%p557_p8)
}
  0x3c   : > { %454 = dma.hbm_to_vmem [thread:$0]  (!%p749_p11), %s747_s17, 128, %s753_s22, %s755_s25, %s632_s28, %s632_s28, %s633_s29  }
  0x3d   : > { %p862_p1 = scmp.ne.s32.totalorder %s857_s20, 0 }
  0x3e   : > { %s782_s26 = sand.u32 (!%p862_p1), 1, %s621_s13   ;;  %p863_p4 = scmp.ne.s32.totalorder (!%p862_p1), %s855_s18, 0 }
  0x3f   : > { %171 = sbr.rel (%p862_p1) target bundleno = 302 (0x12e), region = 32  ;;  %s405_s27 = sshll.u32 (!%p862_p1), %s782_s26, 3 }
  0x40   : > { %s174_s30 = scalar_lea.sflag (!%p862_p1), [#allocation3], %s782_s26  ;;  %s177_s4 = scalar_lea.vmem (!%p862_p1), [#allocation2], %s405_s27 }
  0x44   : > { %604 = dma.done.wait (%p863_p4), %s174_s30, 128  }
  0x45   : > { %606 = vsyncadd (%p863_p4), %s174_s30, 4294967168  ;;  %p864_p6 = scmp.eq.s32.totalorder %s681_s16, 0 }
  0x47   : > { %608 = dma.done.wait (%p864_p6), [#allocation6], 512   ;;  %p865_p8 = pmov %p864_p6 }
  0x48   : > { %v635_v0 = vmov 0.0   ;;  %vm636_vm0 = vmmov 0   ;;  %v502_v1 = vld [vmem:[#allocation5 + $0x18] sm:$0xff]   ;;  %v503_v2 = vld [vmem:[#allocation5 + $0x10] sm:$0xff]   ;;  %v504_v3 = vld [vmem:[#allocation5 + $0x8] sm:$0xff]   ;;  %vm253_vm1 = vcmask 523264  }
  0x49   : > { %610 = vsyncadd (%p865_p8), [#allocation6], 4294966784  ;;  %427 = vmatprep.subr.bf16.mxu0 %v635_v0  ;;  %435 = vmatprep.mubr.msk.bf16.mxu0 %vm636_vm0, %v635_v0  ;;  %v505_v4 = vld [vmem:[#allocation5] sm:$0xff]   ;;  %v506_v5 = vld [vmem:[%s177_s4] sm:$0xff]   ;;  %s407_s18 = sshll.u32 %s782_s26, 4  ;;  %s421_s22 = sshll.u32 %s681_s16, 8 }
  0x4a   : > { %428 = vmatpush3.bf16.msra.mxu0 %v502_v1  ;;  %v408_v6 = vld [vmem:[%s849_s2] ss:$0 sm:$0xff]  ;;  %s203_s29 = scalar_lea.vmem [#allocation7], %s407_s18  ;;  %s804_s8 = scalar_lea.hbm %s850_s3, %s421_s22 }
  0x4b   : > { %429 = vmatprep.subr.bf16.mxu0 %v635_v0  ;;  %s314_s17 = sshll.u32 %s203_s29, 4  ;;  %s301_s9 = scalar_lea.sflag [#allocation4], %s782_s26  ;;  %s799_s17 = int_to_ptr.vmem [resolvable:$true] %s314_s17 }
  0x4c   : > { %s561_s7 = scalar_lea.vmem %s799_s17, 256  ;;  %p866_p11 = scmp.ne.s32.totalorder %s860_s6, 0 }
  0x4d   : > { %p562_p3 = scmp.ne.s32.totalorder %s799_s17, %s561_s7  ;;  %s637_s16 = smov [#allocation7]  }
  0x4e   : > { %430 = vmatpush3.bf16.msra.mxu0 %v503_v2  ;;  %s565_s10 = sshll.u32 %s637_s16, 4  ;;  %s566_s10 = int_to_ptr.vmem [resolvable:$false] %s565_s10 }
  0x4f   : > { %431 = vmatprep.subr.bf16.mxu0 %v635_v0  ;;  %p563_p7 = pnand %p562_p3, %p866_p11  ;;  %s567_s11 = scalar_lea.vmem %s566_s10, 512 }
  0x50   : > { %p568_p10 = scmp.lt.s32.totalorder %s799_s17, %s566_s10  ;;  %p569_p12 = scmp.lt.s32.totalorder %s567_s11, %s561_s7 }
  0x51   : > { %p564_p9 = pneg %p563_p7 }
  0x52   : > { %432 = vmatpush3.bf16.msra.mxu0 %v504_v3  ;;  %p570_p13 = por %p569_p12, %p568_p10 }
  0x53   : > { %433 = vmatprep.subr.bf16.mxu0 %v635_v0 }
  0x54   : > { %p571_p0 = pnand %p570_p13, %p564_p9 }
  0x56   : > { %434 = vmatpush3.bf16.msra.mxu0 %v505_v4 }
  0x59   : > { %436 = vmatmul.mubr.msk.bf16.vlgmr.msra.gmra.mxu0 %vm253_vm1, %v506_v5 }
 0x119   : > { %v291_v7 = vpop.f32.mrf.mxu0 }
 0x11a   : > { %v292_v8 = vadd.f32 %v408_v6, %v291_v7 }
 0x11b   : > { %v437_v9 = vpop.f32.mrf.mxu0 }
 0x11c   : > { %298 = vst [vmem:[%s203_s29] sm:$0xff] %v292_v8 }
 0x11d   : > { %v294_v10 = vpop.f32.mrf.mxu0 }
 0x11e   : > { %v295_v11 = vadd.f32 %v408_v6, %v294_v10 }
 0x11f   : > { %v438_v12 = vpop.f32.mrf.mxu0 }
 0x120   : > { %299 = vst [vmem:[%s203_s29 + $0x8] sm:$0xff] %v295_v11 }
 0x121   : > { %574 = shalt.err (!%p571_p0)
}
 0x122   : > { %s575_s21 = scalar_lea.hbm %s804_s8, 256  ;;  %s579_s4 = scalar_lea.hbm %s850_s3, 512 }
 0x123   : > { %p576_p5 = scmp.ne.s32.totalorder %s804_s8, %s575_s21  ;;  %p580_p4 = scmp.lt.s32.totalorder %s804_s8, %s850_s3 }
 0x124   : > { %p581_p6 = scmp.lt.s32.totalorder %s579_s4, %s575_s21 }
 0x125   : > { %p577_p2 = pnand %p576_p5, %p866_p11 }
 0x126   : > { %p582_p8 = por %p581_p6, %p580_p4 }
 0x127   : > { %p578_p1 = pneg %p577_p2 }
 0x129   : > { %p583_p3 = pnand %p582_p8, %p578_p1 }
 0x12b   : > { %586 = shalt.err (!%p583_p3)
}
 0x12c   : > { %s638_s28 = smov 128   ;;  %s639_s29 = smov 8  }
 0x12d   : > { %445 = dma.vmem_to_hbm [thread:$0]  (%p866_p11), %s799_s17, 256, %s804_s8, %s301_s9, %s638_s28, %s638_s28, %s639_s29  }
 0x12e PF: > { %s329_s22 = sand.u32 1, %s617_s12   ;;  %p867_p7 = scmp.ne.s32.totalorder %s856_s19, 0 }
 0x12f   : > { %p868_p9 = scmp.ge.s32.totalorder %s629_s15, 2  ;;  %s330_s23 = scalar_lea.sflag [#allocation4], %s329_s22 }
 0x131   : > { %p456_p10 = pnand %p868_p9, %p867_p7 }
 0x133   : > { %p457_p12 = pneg %p456_p10 }
 0x135   : > { %612 = dma.done.wait (%p457_p12), %s330_s23, 256  }
 0x136   : > { %614 = vsyncadd (%p457_p12), %s330_s23, 4294967040  ;;  %p17_p13 = scmp.ge.s32.totalorder %s714_s24, 4   ;;  %s869_s12 = smov %s621_s13 }
 0x137   : > { %s870_s13 = smov %s625_s14  ;;  %s871_s14 = smov %s734_s5 }
 0x138   : > { %s872_s15 = smov %s714_s24  ;;  %19 = sbr.rel (!%p17_p13) target bundleno = 6 (0x6), region = 81 }
 0x13d   :  { %335 = vsyncpa [#allocation3], 1 }
 0x13e   :  { %337 = vsyncpa [#allocation3 + $0x1], 1 }
 0x13f   :  { %338 = vsyncpa [#allocation6], 1 }
 0x140   :  { %339 = vsyncpa [#allocation4], 1 }
 0x141   :  { %341 = vsyncpa [#allocation4 + $0x1], 1 }

</bundles_post_ra>
